<compile_context>
chip_gen: v5e
topology: v5e:2x2
jax: 0.10.0
libtpu: 0.0.40
codegen_flags: <defaults>
</compile_context>

<pallas_src>
import functools

import jax
import jax.numpy as jnp
from jax.experimental import pallas as pl
from jax.experimental.pallas import tpu as pltpu


# ----------------------------------------------------------------------------
# Fused Pallas kernel: conv3x3(+ReLU) -> conv1x1 -> joint softmax-entropy
# ----------------------------------------------------------------------------

def _fused_forward_kernel(patches_ref, params_ref, logits_ref, ent_ref=None, *,
                          k_dim, hidden, classes, n, hw):
    """Single grid-less invocation over the whole (tiny) problem.

    patches_ref : (9*Cin, N*HW)        im2col'd input, lane-dense (cols ordered (n,h,w))
    params_ref  : (hidden, k+2+hidden) packed [W1^T | b1 | W2^T(pad) | b2(pad)] slab
    logits_ref  : (hidden, N*HW)       lane-dense logits; rows >= classes are zero pad
    ent_ref     : (1, 1) or None       fused softmax-entropy scalar (None => skipped)
    """
    # Static slices of the packed parameter slab (one argument DMA instead of four).
    w1t = params_ref[:, :k_dim]                                   # (hidden, 9*Cin)
    b1 = params_ref[:, k_dim:k_dim + 1]                           # (hidden, 1)
    w2t = params_ref[:, k_dim + 1:k_dim + 1 + hidden]             # (hidden, hidden), pad rows 0
    b2 = params_ref[:, k_dim + 1 + hidden:k_dim + 2 + hidden]     # (hidden, 1), pad rows 0

    # inc: conv3x3 as one wide matmul + bias + ReLU.  feat (hidden x N*HW f32 ~ 2 vregs)
    # stays in vregs — no VMEM scratch round trip.
    feat = jnp.maximum(
        jnp.dot(w1t, patches_ref[...], preferred_element_type=jnp.float32) + b1,
        0.0)

    # outc: 1x1 conv head.  Full 8-sublane, lane-dense (hidden, N*HW) store.
    logits = jnp.dot(w2t, feat, preferred_element_type=jnp.float32) + b2
    logits_ref[...] = logits.astype(logits_ref.dtype)

    if ent_ref is not None:
        # Reference semantics: softmax over the joint (N*C) axis at every pixel,
        # entropy summed over everything and divided by H*W.  With the grid
        # collapsed, all N lane-halves are already in-register: reduce across
        # them directly (softmax entropy is invariant to the joint-axis order).
        valid = logits[:classes, :]                                # drop sublane pad
        halves = [valid[:, i * hw:(i + 1) * hw] for i in range(n)]  # n x (classes, hw)
        m = halves[0].max(axis=0, keepdims=True)
        for part in halves[1:]:
            m = jnp.maximum(m, part.max(axis=0, keepdims=True))
        z = jnp.zeros_like(m)
        s = jnp.zeros_like(m)
        for part in halves:
            e = jnp.exp(part - m)
            z = z + jnp.sum(e, axis=0, keepdims=True)
            s = s + jnp.sum(e * (part - m), axis=0, keepdims=True)
        h_pix = jnp.log(z) - s / z                                 # exact divide
        ent_ref[...] = (jnp.sum(h_pix) / float(hw)).reshape(1, 1)


def _pack_params(params):
    """Pack [W1^T | b1 | W2^T (classes padded to `hidden` rows) | b2 (padded)]."""
    k_dim, hidden = params["w1"].shape
    classes = params["w2"].shape[1]
    assert classes <= hidden
    w1t = params["w1"].T                                           # (hidden, 9*Cin)
    b1 = params["b1"].reshape(hidden, 1)
    w2t_pad = jnp.zeros((hidden, hidden), jnp.float32).at[:classes, :].set(params["w2"].T)
    b2_pad = jnp.zeros((hidden, 1), jnp.float32).at[:classes, 0].set(params["b2"])
    return jnp.concatenate([w1t, b1, w2t_pad, b2_pad], axis=1)     # (hidden, k+2+hidden)


def fused_model_forward(params, patches_t, *, n, hw, compute_entropy=True):
    """model(x) [+ softmax_entropy(model(x))] in one grid-less pallas_call.

    Returns (logits_t (classes, n*hw), entropy scalar or None).
    """
    k_dim, total = patches_t.shape
    assert total == n * hw
    hidden = params["w1"].shape[1]
    classes = params["w2"].shape[1]

    slab = _pack_params(params)
    kernel = functools.partial(_fused_forward_kernel, k_dim=k_dim, hidden=hidden,
                               classes=classes, n=n, hw=hw)
    # Whole-array-in-VMEM specs: problem fits easily on every generation
    # (patches 36x512 f32 ~ 73 KiB; well under v7x's 64 MiB VMEM).
    # TODO(synk): for large H*W, re-tile the lane axis (BlockSpec over N*HW) and do
    # the 3x3 conv as 9 shift-and-accumulate matmuls instead of host-side im2col.
    in_specs = [pl.BlockSpec(memory_space=pltpu.MemorySpace.VMEM),
                pl.BlockSpec(memory_space=pltpu.MemorySpace.VMEM)]

    if compute_entropy:
        logits_pad, ent = pl.pallas_call(
            kernel,
            out_shape=(jax.ShapeDtypeStruct((hidden, total), jnp.float32),
                       jax.ShapeDtypeStruct((1, 1), jnp.float32)),
            in_specs=in_specs,
            out_specs=(pl.BlockSpec(memory_space=pltpu.MemorySpace.VMEM),
                       pl.BlockSpec(memory_space=pltpu.MemorySpace.VMEM)),
        )(patches_t, slab)
        return logits_pad[:classes], ent[0, 0]

    logits_pad = pl.pallas_call(
        kernel,
        out_shape=jax.ShapeDtypeStruct((hidden, total), jnp.float32),
        in_specs=in_specs,
        out_specs=pl.BlockSpec(memory_space=pltpu.MemorySpace.VMEM),
    )(patches_t, slab)
    return logits_pad[:classes], None


# ----------------------------------------------------------------------------
# Glue: im2col (computed once per forward), gradient mirror, Tent step
# ----------------------------------------------------------------------------

def im2col_3x3_t(x_nhwc):
    """3x3 patches, padding=1 -> (9*Cin, N*H*W), columns ordered (n, h, w)."""
    n, h, w, c = x_nhwc.shape
    xp = jnp.pad(x_nhwc, ((0, 0), (1, 1), (1, 1), (0, 0)))
    cols = [xp[:, i:i + h, j:j + w, :] for i in range(3) for j in range(3)]
    patches = jnp.concatenate(cols, axis=-1)          # (N, H, W, 9C)
    return patches.reshape(n * h * w, 9 * c).T        # (9C, N*H*W)


# Pure-JAX mirror of the exact same math, used only for gradients of the
# adaptation step.  TODO(synk): differentiating the Pallas kernel directly would
# need a custom_vjp; the backward here uses plain-JAX autodiff on identical math.
def _entropy_loss_jax(params, patches_t, *, n, hw):
    feat = jnp.maximum(params["w1"].T @ patches_t + params["b1"][:, None], 0.0)
    logits_t = params["w2"].T @ feat + params["b2"][:, None]   # (classes, n*hw)
    classes = logits_t.shape[0]
    x = logits_t.reshape(classes * n, hw)      # rows = (c, n); order-invariant
    logp = jax.nn.log_softmax(x, axis=0)
    p = jnp.exp(logp)
    return -jnp.sum(p * logp) / hw


def _logits_t_to_nchw(logits_t, n, h, w):
    c = logits_t.shape[0]
    return logits_t.reshape(c, n, h, w).transpose(1, 0, 2, 3)


@functools.partial(jax.jit, static_argnames=("n", "h", "w", "lr"))
def _tent_step(params, patches_t, *, n, h, w, lr):
    """One forward_and_adapt step (episodic=False), fully jitted."""
    hw = h * w
    # TODO(synk): features = model.inc(x), the ReplayMemory/KNN KL-rescale branch
    # and memory.push are host-side buffer ops; memory starts empty (size 0 <=
    # buffer_size) so the branch is never taken — removed as dead work.
    # loss = softmax_entropy(model(x)); loss.backward() + SGD step.  The forward
    # for the loss is the one inside jax.grad (no extra dead Pallas dispatch).
    grads = jax.grad(_entropy_loss_jax)(params, patches_t, n=n, hw=hw)
    params = jax.tree_util.tree_map(lambda p, g: p - lr * g, params, grads)
    # outputs = model(x) with updated params; entropy epilogue statically skipped.
    logits_t, _ = fused_model_forward(params, patches_t, n=n, hw=hw,
                                      compute_entropy=False)
    return _logits_t_to_nchw(logits_t, n, h, w), params


def tent_forward(params, x_nchw, *, steps=1, lr=1e-3):
    """Equivalent of Tent.forward -> forward_and_adapt (episodic=False)."""
    n, _, h, w = x_nchw.shape
    x_nhwc = jnp.transpose(x_nchw, (0, 2, 3, 1)).astype(jnp.float32)
    patches_t = im2col_3x3_t(x_nhwc)   # hoisted: independent of params, computed once
    outputs = None
    for _ in range(steps):
        outputs, params = _tent_step(params, patches_t, n=n, h=h, w=w, lr=lr)
    return outputs, params


# ----------------------------------------------------------------------------
# Params / main
# ----------------------------------------------------------------------------

def init_params(key, cin=4, hidden=8, classes=4):
    k1, k2, k3, k4 = jax.random.split(key, 4)
    # conv3x3 weight stored as (9*Cin, hidden) in (kh, kw, c) row order,
    # matching im2col_3x3_t; conv1x1 weight as (hidden, classes).
    w1 = jax.random.normal(k1, (9 * cin, hidden), jnp.float32) * 0.1
    b1 = jax.random.normal(k2, (hidden,), jnp.float32) * 0.01
    w2 = jax.random.normal(k3, (hidden, classes), jnp.float32) * 0.1
    b2 = jax.random.normal(k4, (classes,), jnp.float32) * 0.01
    return {"w1": w1, "b1": b1, "w2": w2, "b2": b2}


if __name__ == "__main__":
    key = jax.random.PRNGKey(0)
    kx, kp = jax.random.split(key)
    # PyTorch NCHW input: batch=2, channels=4, spatial=16x16
    x = jax.random.normal(kx, (2, 4, 16, 16), jnp.float32)
    params = init_params(kp)

    outputs, new_params = tent_forward(params, x, steps=1, lr=1e-3)
    outputs = jax.block_until_ready(outputs)

    # ---- parity checks against plain-JAX math ----
    n, c, h, w = x.shape
    hw = h * w
    x_nhwc = jnp.transpose(x, (0, 2, 3, 1))
    patches_t = im2col_3x3_t(x_nhwc)

    def ref_forward(p):
        feat = jnp.maximum(p["w1"].T @ patches_t + p["b1"][:, None], 0.0)
        lt = p["w2"].T @ feat + p["b2"][:, None]
        return _logits_t_to_nchw(lt, n, h, w)

    # pre-adaptation forward + fused entropy
    got_t, ent = fused_model_forward(params, patches_t, n=n, hw=hw,
                                     compute_entropy=True)
    got0 = _logits_t_to_nchw(got_t, n, h, w)
    assert jnp.allclose(got0, ref_forward(params), atol=1e-4, rtol=1e-4)
    ent_ref = _entropy_loss_jax(params, patches_t, n=n, hw=hw)
    assert jnp.allclose(ent, ent_ref, rtol=1e-3, atol=1e-3)

    # post-adaptation outputs vs a pure-JAX replica of one Tent step
    grads = jax.grad(_entropy_loss_jax)(params, patches_t, n=n, hw=hw)
    params_ref = {k: params[k] - 1e-3 * grads[k] for k in params}
    assert jnp.allclose(outputs, ref_forward(params_ref), atol=1e-4, rtol=1e-4)
    assert outputs.shape == (2, 4, 16, 16)

    print("KERNEL_OK")
</pallas_src>

<mosaic_0001>
module attributes {stable_mosaic.version = 11 : i64} {
  func.func @_fused_forward_kernel(%arg0: memref<36x512xf32, #tpu.memory_space<vmem>>, %arg1: memref<8x46xf32, #tpu.memory_space<vmem>>, %arg2: memref<8x512xf32, #tpu.memory_space<vmem>>) attributes {dimension_semantics = [], scalar_prefetch = 0 : i64, scratch_operands = 0 : i64, tpu.core_type = #tpu.core_type<tc>} {
    %c0 = arith.constant 0 : index
    %c0_0 = arith.constant 0 : index
    %0 = vector.load %arg1[%c0, %c0_0] : memref<8x46xf32, #tpu.memory_space<vmem>>, vector<8x36xf32>
    %c0_1 = arith.constant 0 : index
    %c36 = arith.constant 36 : index
    %1 = vector.load %arg1[%c0_1, %c36] : memref<8x46xf32, #tpu.memory_space<vmem>>, vector<8x1xf32>
    %c0_2 = arith.constant 0 : index
    %c37 = arith.constant 37 : index
    %2 = vector.load %arg1[%c0_2, %c37] : memref<8x46xf32, #tpu.memory_space<vmem>>, vector<8x8xf32>
    %c0_3 = arith.constant 0 : index
    %c45 = arith.constant 45 : index
    %3 = vector.load %arg1[%c0_3, %c45] : memref<8x46xf32, #tpu.memory_space<vmem>>, vector<8x1xf32>
    %c0_4 = arith.constant 0 : index
    %c0_5 = arith.constant 0 : index
    %4 = vector.load %arg0[%c0_4, %c0_5] : memref<36x512xf32, #tpu.memory_space<vmem>>, vector<36x512xf32>
    %cst = arith.constant dense<0.000000e+00> : vector<8x512xf32>
    %5 = tpu.matmul %0, %4, %cst {dimension_numbers = #tpu.dot_dimension_numbers<[1], [0], [0], [1], [0, 0, 1, 1], [], []>} : vector<8x36xf32>, vector<36x512xf32>, vector<8x512xf32> -> vector<8x512xf32>
    %6 = vector.broadcast %1 : vector<8x1xf32> to vector<8x512xf32>
    %7 = arith.addf %5, %6 : vector<8x512xf32>
    %cst_6 = arith.constant 0.000000e+00 : f32
    %8 = vector.broadcast %cst_6 : f32 to vector<8x512xf32>
    %9 = arith.maximumf %7, %8 : vector<8x512xf32>
    %cst_7 = arith.constant dense<0.000000e+00> : vector<8x512xf32>
    %10 = tpu.matmul %2, %9, %cst_7 {dimension_numbers = #tpu.dot_dimension_numbers<[1], [0], [0], [1], [0, 0, 1, 1], [], []>} : vector<8x8xf32>, vector<8x512xf32>, vector<8x512xf32> -> vector<8x512xf32>
    %11 = vector.broadcast %3 : vector<8x1xf32> to vector<8x512xf32>
    %12 = arith.addf %10, %11 : vector<8x512xf32>
    %c0_8 = arith.constant 0 : index
    %c0_9 = arith.constant 0 : index
    %13 = vector.load %arg2[%c0_8, %c0_9] : memref<8x512xf32, #tpu.memory_space<vmem>>, vector<8x512xf32>
    tpu.vector_store %arg2[%c0_8, %c0_9], %12 {strides = array<i32>} : memref<8x512xf32, #tpu.memory_space<vmem>>, vector<8x512xf32>,
    return
  }
}

</mosaic_0001>

<bundles_post_ra>
// kernel: _tent_step.1
= control target key start
LH: loop header
LB: loop body
LE: loop exit
PB: predicated region body
PF: predicated region fallthrough
CT: control target
= control target key end

     0   :  { %vm40_vm0 = vcmask 1043456   ;;  %v252_v3 = vmov 36   ;;  %vm37_vm1 = vcmask 293888   ;;  %s253_s22 = smov 91   ;;  %v254_v22 = vmov 45   ;;  %s353_s0 = inlined_call_operand.vmem [shape: f32[36,512], index: 0, kind: input, shape index: {}]   ;;  %s354_s1 = inlined_call_operand.vmem [shape: f32[8,46], index: 1, kind: input, shape index: {}]   ;;  %s355_s2 = inlined_call_operand.vmem [shape: f32[8,512], index: 2, kind: output, shape index: {}]  }
   0x1   :  { %v30_v0 = vld [vmem:[%s353_s0 + $0x90] sm:$0xf]  ;;  %v31_v1 = vld [vmem:[%s353_s0 + $0x98] sm:$0xf]  ;;  %249 = vset.pattern.permute.xlu0 %v252_v3  ;;  %v28_v7 = vld [vmem:[%s353_s0 + $0x80] sm:$0xf]  ;;  %250 = vset.pattern.permute.xlu1 %v254_v22 }
   0x2   :  { %v26_v2 = vld [vmem:[%s353_s0 + $0x70] sm:$0xff]  ;;  %238 = vmatpush.msk.msra.mxu2 %vm40_vm0, %v30_v0  ;;  %240 = vmatpush.msk.msra.mxu3 %vm40_vm0, %v31_v1  ;;  %v27_v4 = vld [vmem:[%s353_s0 + $0x78] sm:$0xff]  ;;  %v29_v8 = vld [vmem:[%s353_s0 + $0x88] sm:$0xf]  ;;  %vm143_vm2 = vcmask 64512  }
   0x3   :  { %v22_v5 = vld [vmem:[%s353_s0 + $0x50] sm:$0xff]  ;;  %v23_v6 = vld [vmem:[%s353_s0 + $0x58] sm:$0xff]  ;;  %v24_v9 = vld [vmem:[%s353_s0 + $0x60] sm:$0xff]  ;;  %234 = vmatpush.msk.msra.mxu0 %vm40_vm0, %v28_v7  ;;  %236 = vmatpush.msk.msra.mxu1 %vm40_vm0, %v29_v8 }
   0x4   :  { %105 = vmatpush.msra.mxu2 %v26_v2  ;;  %125 = vmatpush.msra.mxu3 %v27_v4  ;;  %v25_v10 = vld [vmem:[%s353_s0 + $0x68] sm:$0xff]  ;;  %v18_v11 = vld [vmem:[%s353_s0 + $0x30] sm:$0xff]  ;;  %v19_v12 = vld [vmem:[%s353_s0 + $0x38] sm:$0xff] }
   0x5   :  { %v20_v13 = vld [vmem:[%s353_s0 + $0x40] sm:$0xff]  ;;  %v21_v14 = vld [vmem:[%s353_s0 + $0x48] sm:$0xff]  ;;  %65 = vmatpush.msra.mxu0 %v24_v9  ;;  %85 = vmatpush.msra.mxu1 %v25_v10  ;;  %v14_v15 = vld [vmem:[%s353_s0 + $0x10] sm:$0xff] }
   0x6   :  { %106 = vmatpush.msra.mxu2 %v22_v5  ;;  %126 = vmatpush.msra.mxu3 %v23_v6  ;;  %v15_v16 = vld [vmem:[%s353_s0 + $0x18] sm:$0xff]  ;;  %v11_v17 = vld [vmem:[%s354_s1] sm:$0xff]  ;;  %v17_v19 = vld [vmem:[%s353_s0 + $0x28] sm:$0xff] }
   0x7   :  { %66 = vmatpush.msra.mxu0 %v20_v13  ;;  %86 = vmatpush.msra.mxu1 %v21_v14  ;;  %v16_v18 = vld [vmem:[%s353_s0 + $0x20] sm:$0xff]  ;;  %v13_v21 = vld [vmem:[%s353_s0 + $0x8] sm:$0xff] }
   0x8   :  { %107 = vmatpush.msra.mxu2 %v18_v11  ;;  %127 = vmatpush.msra.mxu3 %v19_v12  ;;  %v12_v20 = vld [vmem:[%s353_s0] sm:$0xff] }
   0x9   :  { %67 = vmatpush.msra.mxu0 %v16_v18  ;;  %87 = vmatpush.msra.mxu1 %v17_v19 }
   0xa   :  { %108 = vmatpush.msra.mxu2 %v14_v15  ;;  %128 = vmatpush.msra.mxu3 %v15_v16 }
   0xb   :  { %239 = vmatmul.msk.f32.vlgmr.msra.gmra.mxu2 %vm37_vm1, %v11_v17  ;;  %241 = vmatmul.msk.f32.vlgmr.msra.gmra.mxu3 %vm37_vm1, %v11_v17 }
   0xc   :  { %34 = vperm.xlu0 %249, %v11_v17   ;;  %68 = vmatpush.msra.mxu0 %v12_v20 }
   0xd   :  { %88 = vmatpush.msra.mxu1 %v13_v21  ;;  %235 = vmatmul.msk.f32.vlgmr.msra.gmra.mxu0 %vm37_vm1, %v11_v17 }
   0xe   :  { %237 = vmatmul.msk.f32.vlgmr.msra.gmra.mxu1 %vm37_vm1, %v11_v17  ;;  %138 = vperm.xlu1 %250, %v11_v17  }
  0x14   :  { %141 = vrot.lane.b32.xlu0 %v11_v17, %s253_s22 }
  0x15   :  { %251 = vset.pattern.permute.xlu0 %v254_v22 }
  0x7e   :  { %v35_v23 = vpop.permute.xlu0 %34 }
  0x80   :  { %v139_v37 = vpop.permute.xlu1 %138 }
  0x86   :  { %v142_v34 = vpop.permute.xlu0 %141 }
  0x8a   :  { %v70_v24 = vpop.f32.mrf.mxu0 }
  0x8b   :  { %v90_v25 = vpop.f32.mrf.mxu1  ;;  %v71_v26 = vadd.f32 %v70_v24, %v35_v23 }
  0x8c   :  { %v91_v27 = vadd.f32 %v90_v25, %v35_v23 }
  0x8d   :  { %v133_v30 = vmax.f32 %v71_v26, 0.0 }
  0x8e   :  { %v110_v28 = vpop.f32.mrf.mxu2  ;;  %v130_v29 = vpop.f32.mrf.mxu3  ;;  %v134_v31 = vmax.f32 %v91_v27, 0.0 }
  0x8f   :  { %v111_v32 = vadd.f32 %v110_v28, %v35_v23  ;;  %v131_v33 = vadd.f32 %v130_v29, %v35_v23  ;;  %161 = vmatpush.msrb.mxu0 %v133_v30 }
  0x90   :  { %181 = vmatpush.msrb.mxu1 %v134_v31  ;;  %242 = vmatmul.msk.f32.vlgmr.msrb.gmra.mxu0 %vm143_vm2, %v142_v34 }
  0x91   :  { %v135_v35 = vmax.f32 %v111_v32, 0.0  ;;  %v136_v36 = vmax.f32 %v131_v33, 0.0  ;;  %243 = vmatmul.msk.f32.vlgmr.msrb.gmra.mxu1 %vm143_vm2, %v142_v34 }
  0x93   :  { %201 = vmatpush.msrb.mxu2 %v135_v35  ;;  %221 = vmatpush.msrb.mxu3 %v136_v36 }
  0x94   :  { %244 = vmatmul.msk.f32.vlgmr.msrb.gmra.mxu2 %vm143_vm2, %v142_v34  ;;  %245 = vmatmul.msk.f32.vlgmr.msrb.gmra.mxu3 %vm143_vm2, %v142_v34 }
 0x10d   :  { %v163_v38 = vpop.f32.mrf.mxu0 }
 0x10e   :  { %v183_v39 = vpop.f32.mrf.mxu1  ;;  %v164_v40 = vadd.f32 %v163_v38, %v139_v37 }
 0x10f   :  { %v184_v41 = vadd.f32 %v183_v39, %v139_v37 }
 0x110   :  { %226 = vst [vmem:[%s355_s2] sm:$0xff] %v164_v40 }
 0x111   :  { %227 = vst [vmem:[%s355_s2 + $0x8] sm:$0xff] %v184_v41 }
 0x117   :  { %v203_v42 = vpop.f32.mrf.mxu2  ;;  %v223_v43 = vpop.f32.mrf.mxu3 }
 0x118   :  { %v204_v44 = vadd.f32 %v203_v42, %v139_v37  ;;  %v224_v45 = vadd.f32 %v223_v43, %v139_v37 }
 0x11a   :  { %228 = vst [vmem:[%s355_s2 + $0x10] sm:$0xff] %v204_v44 }
 0x11b   :  { %229 = vst [vmem:[%s355_s2 + $0x18] sm:$0xff] %v224_v45 }

</bundles_post_ra>
